<compile_context>
chip_gen: v5e
topology: v5e:2x2
jax: 0.10.0
libtpu: 0.0.40
codegen_flags: <defaults>
</compile_context>

<pallas_src>
import math

import jax
import jax.numpy as jnp
from jax.experimental import pallas as pl
from jax.experimental.pallas import tpu as pltpu

_NEG_SLOPE = 0.01


def _round_up(x, m):
    return ((x + m - 1) // m) * m


def critic_kernel(x_ref, w1_ref, b1_ref, w2_ref, b2_ref, w3_ref, b3_ref, q_ref):
    """Fused 3-layer MLP: two MXU matmuls + a VPU/XLU output reduction."""
    neg = jnp.float32(_NEG_SLOPE)

    # Layer 1: single K=32 matmul (concat fused in the wrapper).
    h1 = jnp.dot(x_ref[...], w1_ref[...],
                 preferred_element_type=jnp.float32) + b1_ref[...]
    h1 = jnp.where(h1 > 0, h1, neg * h1)

    # Layer 2.
    h2 = jnp.dot(h1, w2_ref[...],
                 preferred_element_type=jnp.float32) + b2_ref[...]
    h2 = jnp.where(h2 > 0, h2, neg * h2)

    # Output layer: N=1 matmul -> VPU multiply + lane reduction.
    # w3 is a (1, 64) row; b3 is an SMEM scalar.
    q = jnp.sum(h2 * w3_ref[...], axis=-1, keepdims=True) + b3_ref[0]
    q_ref[...] = q.astype(q_ref.dtype)


def critic_forward(state, action, action_parameters, params, *, block_b=2048):
    """Run the fused Critic MLP.

    Gridless single shot for B <= block_b; otherwise a batch-tiled "parallel"
    grid with weights resident (constant index_map) and a tile chosen so the
    grid has >= 2 (preferably an even number of) steps for v7x megacore.
    """
    B = state.shape[0]
    w1, b1, w2, b2, w3, b3 = params
    input_dim = w1.shape[0]
    h1_dim = w1.shape[1]
    h2_dim = w2.shape[1]

    # Fuse the concat once in the wrapper: one contiguous (B, 32) stream.
    x = jnp.concatenate((state, action, action_parameters), axis=-1)
    assert x.shape[1] == input_dim

    out_shape = jax.ShapeDtypeStruct((B, 1), jnp.float32)
    vmem = pl.BlockSpec(memory_space=pltpu.MemorySpace.VMEM)
    smem = pl.BlockSpec(memory_space=pltpu.MemorySpace.SMEM)

    weight_elems = (input_dim * h1_dim + h1_dim
                    + h1_dim * h2_dim + h2_dim
                    + h2_dim + 1)
    cost = pl.CostEstimate(
        flops=2 * B * (input_dim * h1_dim + h1_dim * h2_dim + h2_dim),
        transcendentals=0,
        bytes_accessed=B * (input_dim + 1) * 4 + weight_elems * 4,
    )

    args = (x, w1, b1, w2, b2, w3, b3)

    if B <= block_b:
        # Small/medium batch: single shot, no grid-step overhead; whole
        # problem is well under 1 MB of VMEM.
        return pl.pallas_call(
            critic_kernel,
            out_shape=out_shape,
            in_specs=[vmem] * 6 + [smem],
            out_specs=vmem,
            cost_estimate=cost,
        )(*args)

    # Large batch: tile over batch so activation DMAs pipeline with compute.
    # Keep the grid >= 2 steps (and even when cheap) so "parallel" semantics
    # shard the steps across both TensorCores on v7x.
    tb = min(block_b, _round_up(pl.cdiv(B, 2), 8))
    steps = pl.cdiv(B, tb)
    if steps % 2 == 1 and steps > 1:
        tb = _round_up(pl.cdiv(B, steps + 1), 8)
        steps = pl.cdiv(B, tb)

    row = lambda i: (i, 0)      # batch-tiled operands
    const = lambda i: (0, 0)    # weights: constant block index -> stay resident

    in_specs = [
        pl.BlockSpec((tb, input_dim), row),
        pl.BlockSpec((input_dim, h1_dim), const),
        pl.BlockSpec((1, h1_dim), const),
        pl.BlockSpec((h1_dim, h2_dim), const),
        pl.BlockSpec((1, h2_dim), const),
        pl.BlockSpec((1, h2_dim), const),
        smem,
    ]
    return pl.pallas_call(
        critic_kernel,
        out_shape=out_shape,
        grid=(steps,),
        in_specs=in_specs,
        out_specs=pl.BlockSpec((tb, 1), row),
        compiler_params=pltpu.CompilerParams(
            dimension_semantics=("parallel",)),
        cost_estimate=cost,
    )(*args)


def init_critic_params(key, obs_dim, action_dim, action_parameters_dim):
    """Mirror the PyTorch __init__.

    kaiming_normal_(nonlinearity='leaky_relu'): std = gain / sqrt(fan_in),
    gain = sqrt(2 / (1 + 0.01**2)); biases zero; output layer ~ N(0, 0.01^2).
    Weights stored as [in, out]; W3 stored as a (1, 64) row for the VPU reduce.
    """
    input_dim = obs_dim + action_dim + action_parameters_dim
    k1, k2, k3 = jax.random.split(key, 3)

    gain = math.sqrt(2.0 / (1.0 + 0.01 ** 2))

    std1 = gain / math.sqrt(input_dim)
    w1 = std1 * jax.random.normal(k1, (input_dim, 128), dtype=jnp.float32)
    b1 = jnp.zeros((1, 128), dtype=jnp.float32)

    std2 = gain / math.sqrt(128)
    w2 = std2 * jax.random.normal(k2, (128, 64), dtype=jnp.float32)
    b2 = jnp.zeros((1, 64), dtype=jnp.float32)

    w3 = 0.01 * jax.random.normal(k3, (1, 64), dtype=jnp.float32)   # row form of (64, 1)
    b3 = jnp.zeros((1,), dtype=jnp.float32)

    return (w1, b1, w2, b2, w3, b3)


def critic_forward_ref(state, action, action_parameters, params):
    """Pure-JAX reference mirroring the PyTorch math."""
    w1, b1, w2, b2, w3, b3 = params
    x = jnp.concatenate((state, action, action_parameters), axis=-1)
    h1 = x @ w1 + b1
    h1 = jnp.where(h1 > 0, h1, 0.01 * h1)
    h2 = h1 @ w2 + b2
    h2 = jnp.where(h2 > 0, h2, 0.01 * h2)
    return h2 @ w3.T + b3[None, :]


def _make_inputs(key, batch, obs_dim, action_dim, action_parameters_dim):
    ks, ka, kp = jax.random.split(key, 3)
    state = jax.random.normal(ks, (batch, obs_dim), dtype=jnp.float32)
    action = jax.random.normal(ka, (batch, action_dim), dtype=jnp.float32)
    aparams = jax.random.normal(kp, (batch, action_parameters_dim), dtype=jnp.float32)
    return state, action, aparams


if __name__ == "__main__":
    obs_dim, action_dim, action_parameters_dim = 16, 4, 12

    key = jax.random.PRNGKey(0)
    k_params, k_in = jax.random.split(key)
    params = init_critic_params(k_params, obs_dim, action_dim, action_parameters_dim)

    # --- small batch: gridless single-shot path ---
    batch = 8
    s, a, p = _make_inputs(k_in, batch, obs_dim, action_dim, action_parameters_dim)
    q = jax.block_until_ready(critic_forward(s, a, p, params))
    q_ref = critic_forward_ref(s, a, p, params)
    assert q.shape == (batch, 1)
    assert jnp.allclose(q, q_ref, atol=1e-5, rtol=1e-5), "small-batch mismatch"

    # --- large batch, exact multiple of the tile: even 2-step grid ---
    big_batch = 4096
    s_b, a_b, p_b = _make_inputs(jax.random.PRNGKey(1), big_batch,
                                 obs_dim, action_dim, action_parameters_dim)
    q_b = jax.block_until_ready(critic_forward(s_b, a_b, p_b, params, block_b=2048))
    q_b_ref = critic_forward_ref(s_b, a_b, p_b, params)
    assert q_b.shape == (big_batch, 1)
    assert jnp.allclose(q_b, q_b_ref, atol=1e-4, rtol=1e-4), "large-batch mismatch"

    # --- large batch NOT a multiple of the tile: partial last tile / masked
    #     output writeback (correctness concern from the perf review) ---
    odd_batch = 3000
    s_o, a_o, p_o = _make_inputs(jax.random.PRNGKey(2), odd_batch,
                                 obs_dim, action_dim, action_parameters_dim)
    q_o = jax.block_until_ready(critic_forward(s_o, a_o, p_o, params, block_b=1024))
    q_o_ref = critic_forward_ref(s_o, a_o, p_o, params)
    assert q_o.shape == (odd_batch, 1)
    assert jnp.all(jnp.isfinite(q_o)), "padded rows leaked into output"
    assert jnp.allclose(q_o, q_o_ref, atol=1e-4, rtol=1e-4), "partial-tile mismatch"

    print("KERNEL_OK")
</pallas_src>

<mosaic_0001>
module attributes {stable_mosaic.version = 11 : i64} {
  func.func @critic_kernel(%arg0: memref<8x32xf32, #tpu.memory_space<vmem>>, %arg1: memref<32x128xf32, #tpu.memory_space<vmem>>, %arg2: memref<1x128xf32, #tpu.memory_space<vmem>>, %arg3: memref<128x64xf32, #tpu.memory_space<vmem>>, %arg4: memref<1x64xf32, #tpu.memory_space<vmem>>, %arg5: memref<1x64xf32, #tpu.memory_space<vmem>>, %arg6: memref<1xf32, #tpu.memory_space<smem>>, %arg7: memref<8x1xf32, #tpu.memory_space<vmem>>) attributes {dimension_semantics = [], scalar_prefetch = 0 : i64, scratch_operands = 0 : i64, tpu.core_type = #tpu.core_type<tc>} {
    %c0 = arith.constant 0 : index
    %c0_0 = arith.constant 0 : index
    %0 = vector.load %arg0[%c0, %c0_0] : memref<8x32xf32, #tpu.memory_space<vmem>>, vector<8x32xf32>
    %c0_1 = arith.constant 0 : index
    %c0_2 = arith.constant 0 : index
    %1 = vector.load %arg1[%c0_1, %c0_2] : memref<32x128xf32, #tpu.memory_space<vmem>>, vector<32x128xf32>
    %cst = arith.constant dense<0.000000e+00> : vector<8x128xf32>
    %2 = tpu.matmul %0, %1, %cst {dimension_numbers = #tpu.dot_dimension_numbers<[1], [0], [0], [1], [0, 0, 1, 1], [], []>} : vector<8x32xf32>, vector<32x128xf32>, vector<8x128xf32> -> vector<8x128xf32>
    %c0_3 = arith.constant 0 : index
    %c0_4 = arith.constant 0 : index
    %3 = vector.load %arg2[%c0_3, %c0_4] : memref<1x128xf32, #tpu.memory_space<vmem>>, vector<1x128xf32>
    %4 = vector.broadcast %3 : vector<1x128xf32> to vector<8x128xf32>
    %5 = arith.addf %2, %4 : vector<8x128xf32>
    %cst_5 = arith.constant 0.000000e+00 : f32
    %6 = vector.broadcast %cst_5 : f32 to vector<8x128xf32>
    %7 = arith.cmpf ogt, %5, %6 : vector<8x128xf32>
    %cst_6 = arith.constant 0.00999999977 : f32
    %8 = vector.broadcast %cst_6 : f32 to vector<8x128xf32>
    %9 = arith.mulf %8, %5 : vector<8x128xf32>
    %10 = arith.select %7, %5, %9 : vector<8x128xi1>, vector<8x128xf32>
    %c0_7 = arith.constant 0 : index
    %c0_8 = arith.constant 0 : index
    %11 = vector.load %arg3[%c0_7, %c0_8] : memref<128x64xf32, #tpu.memory_space<vmem>>, vector<128x64xf32>
    %cst_9 = arith.constant dense<0.000000e+00> : vector<8x64xf32>
    %12 = tpu.matmul %10, %11, %cst_9 {dimension_numbers = #tpu.dot_dimension_numbers<[1], [0], [0], [1], [0, 0, 1, 1], [], []>} : vector<8x128xf32>, vector<128x64xf32>, vector<8x64xf32> -> vector<8x64xf32>
    %c0_10 = arith.constant 0 : index
    %c0_11 = arith.constant 0 : index
    %13 = vector.load %arg4[%c0_10, %c0_11] : memref<1x64xf32, #tpu.memory_space<vmem>>, vector<1x64xf32>
    %14 = vector.broadcast %13 : vector<1x64xf32> to vector<8x64xf32>
    %15 = arith.addf %12, %14 : vector<8x64xf32>
    %cst_12 = arith.constant 0.000000e+00 : f32
    %16 = vector.broadcast %cst_12 : f32 to vector<8x64xf32>
    %17 = arith.cmpf ogt, %15, %16 : vector<8x64xf32>
    %cst_13 = arith.constant 0.00999999977 : f32
    %18 = vector.broadcast %cst_13 : f32 to vector<8x64xf32>
    %19 = arith.mulf %18, %15 : vector<8x64xf32>
    %20 = arith.select %17, %15, %19 : vector<8x64xi1>, vector<8x64xf32>
    %c0_14 = arith.constant 0 : index
    %c0_15 = arith.constant 0 : index
    %21 = vector.load %arg5[%c0_14, %c0_15] : memref<1x64xf32, #tpu.memory_space<vmem>>, vector<1x64xf32>
    %22 = vector.broadcast %21 : vector<1x64xf32> to vector<8x64xf32>
    %23 = arith.mulf %20, %22 : vector<8x64xf32>
    %cst_16 = arith.constant dense<0.000000e+00> : vector<8xf32>
    %24 = vector.multi_reduction <add>, %23, %cst_16 [1] : vector<8x64xf32> to vector<8xf32>
    %25 = vector.shape_cast %24 : vector<8xf32> to vector<8x1xf32>
    %c0_17 = arith.constant 0 : index
    %26 = memref.load %arg6[%c0_17] : memref<1xf32, #tpu.memory_space<smem>>
    %27 = vector.broadcast %26 : f32 to vector<8x1xf32>
    %28 = arith.addf %25, %27 : vector<8x1xf32>
    %c0_18 = arith.constant 0 : index
    %c0_19 = arith.constant 0 : index
    %29 = vector.load %arg7[%c0_18, %c0_19] : memref<8x1xf32, #tpu.memory_space<vmem>>, vector<8x1xf32>
    tpu.vector_store %arg7[%c0_18, %c0_19], %28 {strides = array<i32>} : memref<8x1xf32, #tpu.memory_space<vmem>>, vector<8x1xf32>,
    return
  }
}

</mosaic_0001>

<bundles_post_ra>
// kernel: tpu_custom_call.1
= control target key start
LH: loop header
LB: loop body
LE: loop exit
PB: predicated region body
PF: predicated region fallthrough
CT: control target
= control target key end

     0   :  { %vm36_vm0 = vcmask 261120   ;;  %vm111_vm3 = vcmask 523264   ;;  %vm118_vm4 = vcmask 7168   ;;  %s246_s1 = inlined_call_operand.vmem [shape: f32[32,128], index: 1, kind: input, shape index: {}]   ;;  %s247_s3 = inlined_call_operand.vmem [shape: f32[128,64], index: 3, kind: input, shape index: {}]   ;;  %s248_s0 = inlined_call_operand.vmem [shape: f32[8,32], index: 0, kind: input, shape index: {}]   ;;  %s249_s2 = inlined_call_operand.vmem [shape: f32[1,128], index: 2, kind: input, shape index: {}]   ;;  %s250_s4 = inlined_call_operand.vmem [shape: f32[1,64], index: 4, kind: input, shape index: {}]   ;;  %s251_s5 = inlined_call_operand.vmem [shape: f32[1,64], index: 5, kind: input, shape index: {}]   ;;  %s252_s6 = inlined_call_operand.<no memory space> [shape: f32[1], index: 6, kind: input, shape index: {}]   ;;  %s253_s7 = inlined_call_operand.vmem [shape: f32[8,1], index: 7, kind: output, shape index: {}]  }
   0x1   :  { %v31_v0 = vld [vmem:[%s246_s1 + $0x18] sm:$0xff]  ;;  %v30_v1 = vld [vmem:[%s246_s1 + $0x10] sm:$0xff]  ;;  %v29_v3 = vld [vmem:[%s246_s1 + $0x8] sm:$0xff]  ;;  %v116_v34 = vstv %s252_s6 }
   0x2   :  { %52 = vmatpush.msra.mxu0 %v31_v0  ;;  %v78_v2 = vld [vmem:[%s247_s3 + $0x78] sm:$0xff]  ;;  %v77_v4 = vld [vmem:[%s247_s3 + $0x70] sm:$0xff]  ;;  %v76_v5 = vld [vmem:[%s247_s3 + $0x68] sm:$0xff] }
   0x3   :  { %83 = vmatpush.msra.mxu1 %v78_v2  ;;  %v28_v6 = vld [vmem:[%s246_s1] sm:$0xff]  ;;  %v74_v9 = vld [vmem:[%s247_s3 + $0x58] sm:$0xff]  ;;  %v73_v10 = vld [vmem:[%s247_s3 + $0x50] sm:$0xff] }
   0x4   :  { %53 = vmatpush.msra.mxu0 %v30_v1  ;;  %v27_v7 = vld [vmem:[%s248_s0] sm:$0xff]  ;;  %v72_v11 = vld [vmem:[%s247_s3 + $0x48] sm:$0xff]  ;;  %v70_v13 = vld [vmem:[%s247_s3 + $0x38] sm:$0xff] }
   0x5   :  { %84 = vmatpush.msra.mxu1 %v77_v4  ;;  %v75_v8 = vld [vmem:[%s247_s3 + $0x60] sm:$0xff]  ;;  %v69_v14 = vld [vmem:[%s247_s3 + $0x30] sm:$0xff]  ;;  %v68_v15 = vld [vmem:[%s247_s3 + $0x28] sm:$0xff] }
   0x6   :  { %54 = vmatpush.msra.mxu0 %v29_v3  ;;  %v71_v12 = vld [vmem:[%s247_s3 + $0x40] sm:$0xff]  ;;  %v66_v17 = vld [vmem:[%s247_s3 + $0x18] sm:$0xff]  ;;  %v65_v18 = vld [vmem:[%s247_s3 + $0x10] sm:$0xff] }
   0x7   :  { %85 = vmatpush.msra.mxu1 %v76_v5  ;;  %v67_v16 = vld [vmem:[%s247_s3 + $0x20] sm:$0xff]  ;;  %v64_v19 = vld [vmem:[%s247_s3 + $0x8] sm:$0xff] }
   0x8   :  { %55 = vmatpush.msra.mxu0 %v28_v6  ;;  %v63_v20 = vld [vmem:[%s247_s3] sm:$0xff] }
   0x9   :  { %124 = vmatmul.msk.f32.vlgmr.msra.gmra.mxu0 %vm36_vm0, %v27_v7  ;;  %86 = vmatpush.msra.mxu1 %v75_v8  ;;  %v125_v21 = vld [vmem:[%s249_s2] ss:$0 sm:$0xff] }
   0xa   :  { %v126_v26 = vld [vmem:[%s250_s4] ss:$0 sm:$0xff] }
   0xb   :  { %87 = vmatpush.msra.mxu1 %v74_v9  ;;  %v127_v29 = vld [vmem:[%s251_s5] ss:$0 sm:$0xff] }
   0xd   :  { %88 = vmatpush.msra.mxu1 %v73_v10 }
   0xf   :  { %89 = vmatpush.msra.mxu1 %v72_v11 }
  0x11   :  { %90 = vmatpush.msra.mxu1 %v71_v12 }
  0x13   :  { %91 = vmatpush.msra.mxu1 %v70_v13 }
  0x15   :  { %92 = vmatpush.msra.mxu1 %v69_v14 }
  0x17   :  { %93 = vmatpush.msra.mxu1 %v68_v15 }
  0x19   :  { %94 = vmatpush.msra.mxu1 %v67_v16 }
  0x1b   :  { %95 = vmatpush.msra.mxu1 %v66_v17 }
  0x1d   :  { %96 = vmatpush.msra.mxu1 %v65_v18 }
  0x1f   :  { %97 = vmatpush.msra.mxu1 %v64_v19 }
  0x21   :  { %98 = vmatpush.msra.mxu1 %v63_v20 }
  0x86   :  { %v57_v22 = vpop.f32.mrf.mxu0 }
  0x87   :  { %v58_v23 = vadd.f32 %v125_v21, %v57_v22 }
  0x89   :  { %vm60_vm1 = vcmp.gt.f32.partialorder %v58_v23, 0.0  ;;  %v61_v24 = vmul.f32 0.01, %v58_v23 }
  0x8b   :  { %v62_v25 = vsel %vm60_vm1, %v58_v23, %v61_v24 }
  0x8c   :  { %99 = vmatmul.f32.vlgmr.msra.gmra.mxu1 %v62_v25 }
 0x109   :  { %v100_v27 = vpop.f32.mrf.mxu1 }
 0x10a   :  { %v101_v28 = vadd.f32 %v126_v26, %v100_v27 }
 0x10c   :  { %v104_v30 = vmul.f32 0.01, %v101_v28  ;;  %vm103_vm2 = vcmp.gt.f32.partialorder %v101_v28, 0.0 }
 0x10e   :  { %v105_v31 = vsel %vm103_vm2, %v101_v28, %v104_v30 }
 0x10f   :  { %v110_v32 = vmul.f32 %v127_v29, %v105_v31 }
 0x111   :  { %v112_v33 = vsel %vm111_vm3, %v110_v32, 0.0 }
 0x112   :  { %113 = vadd.xlane.f32.xlu0 %v112_v33 }
 0x185   :  { %v114_v35 = vpop.xlane.xlu0 %113 }
 0x186   :  { %v117_v36 = vadd.f32 %v116_v34, %v114_v35 }
 0x188   :  { %119 = vst.msk [vmem:[%s253_s7] sm:$0xff] %vm118_vm4, %v117_v36 }

</bundles_post_ra>
